<compile_context>
chip_gen: v7x
topology: tpu7x:2x2x1
jax: 0.10.0
libtpu: 0.0.40
codegen_flags: <defaults>
</compile_context>

<pallas_src>
import jax
import jax.numpy as jnp
from jax import lax
from jax.experimental import pallas as pl
from jax.experimental.pallas import tpu as pltpu


def _round_up(x, m):
    return -(-x // m) * m


def bow_linear_kernel(tok_ref, wt_ref, b_ref, out_ref):
    # tok_ref : (tb, L)  int32 VMEM  token ids for this batch tile
    # wt_ref  : (tv, Cp) f32   VMEM  vocab-tile of the transposed, padded weight
    # b_ref   : (1, Cp)  f32   VMEM  lane-padded bias
    # out_ref : (tb, Cp) f32   VMEM  output tile, resident across the vocab axis
    k = pl.program_id(1)

    @pl.when(k == 0)
    def _():
        # Initialize the resident accumulator with the bias (added once).
        out_ref[...] = jnp.broadcast_to(b_ref[...], out_ref.shape)

    tv = wt_ref.shape[0]
    # Column ids covered by this vocab tile: (1, 1, tv), lane-axis iota.
    col = k * tv + lax.broadcasted_iota(jnp.int32, (1, 1, tv), 2)
    tok = tok_ref[...]                                   # (tb, L) int32
    # Bag-of-words counts for this vocab tile: (tb, tv) float32.
    # Out-of-range / padded-column ids never match -> contribute zero,
    # matching the one-hot semantics of create_bow_matrix().
    # TODO(synk): for very long sequences, tile L as well to bound the
    # (tb, L, tv) compare intermediate.
    counts = jnp.sum((tok[:, :, None] == col).astype(jnp.float32), axis=1)

    # MXU matmul against the weight tile, accumulated in f32.
    out_ref[...] += jnp.dot(counts, wt_ref[...],
                            preferred_element_type=jnp.float32)


def bow_classifier(tokens, weight, bias, *, tb=None, tv=None):
    """tokens: (B, L) int, weight: (C, V) f32, bias: (C,) f32 -> (B, C) f32.

    Equivalent to nn.Linear(V, C) applied to the bag-of-words count matrix:
        y = bow(tokens) @ W.T + b
    """
    B, L = tokens.shape
    C, V = weight.shape

    # Lane-dense class dim.
    Cp = _round_up(C, 128)

    # Vocab tile (contraction tile); keep it modest so the double-buffered
    # weight tile stays well inside VMEM even on v7x (64 MiB).
    if tv is None:
        tv = min(_round_up(V, 128), 2048)
    assert tv % 128 == 0
    Vp = _round_up(V, tv)

    # Batch tile: multiple of 8 sublanes (or the whole batch).
    if tb is None:
        tb = next((c for c in (256, 128, 64, 32, 16, 8) if B % c == 0), B)
    assert B % tb == 0

    # Pre-transposed, padded weight (Vp, Cp) and padded bias (1, Cp).
    wt = jnp.zeros((Vp, Cp), jnp.float32).at[:V, :C].set(
        weight.astype(jnp.float32).T)
    b2 = jnp.zeros((1, Cp), jnp.float32).at[:, :C].set(
        bias.astype(jnp.float32)[None, :])

    grid = (B // tb, Vp // tv)
    out_padded = pl.pallas_call(
        bow_linear_kernel,
        out_shape=jax.ShapeDtypeStruct((B, Cp), jnp.float32),
        grid_spec=pltpu.PrefetchScalarGridSpec(
            num_scalar_prefetch=0,
            grid=grid,
            in_specs=[
                pl.BlockSpec((tb, L), lambda i, k: (i, 0)),    # tokens tile
                pl.BlockSpec((tv, Cp), lambda i, k: (k, 0)),   # weight V-tile
                pl.BlockSpec((1, Cp), lambda i, k: (0, 0)),    # bias
            ],
            out_specs=pl.BlockSpec((tb, Cp), lambda i, k: (i, 0)),
        ),
        compiler_params=pltpu.CompilerParams(
            # batch tiles independent (megacore), vocab axis is a reduction
            dimension_semantics=("parallel", "arbitrary"),
        ),
    )(tokens.astype(jnp.int32), wt, b2)

    return out_padded[:, :C]


if __name__ == "__main__":
    # Small deterministic shapes consistent with the module; chosen so both
    # grid axes take multiple steps (batch tiles x vocab-reduction tiles).
    B, L, V, C = 32, 16, 300, 8   # batch, seq len, vocab_size, n_classes

    key = jax.random.PRNGKey(0)
    k_tok, k_w, k_b = jax.random.split(key, 3)

    tokens = jax.random.randint(k_tok, (B, L), 0, V, dtype=jnp.int32)
    # Deterministic synthetic parameters mimicking nn.Linear(V, C).
    weight = (jax.random.normal(k_w, (C, V), dtype=jnp.float32)
              / jnp.sqrt(jnp.float32(V)))
    bias = jax.random.normal(k_b, (C,), dtype=jnp.float32) * 0.1

    out = bow_classifier(tokens, weight, bias, tb=8, tv=128)  # grid = (4, 3)
    out = jax.block_until_ready(out)

    # Pure-JAX reference (explicit bag-of-words + linear).
    bow_ref = jnp.sum(
        (tokens[:, :, None] == jnp.arange(V)[None, None, :]).astype(jnp.float32),
        axis=1,
    )
    ref = bow_ref @ weight.T + bias
    assert out.shape == (B, C)
    assert jnp.allclose(out, ref, atol=1e-4, rtol=1e-4), "mismatch vs reference"

    # predict() equivalent (argmax over classes) in plain JAX glue.
    _ = jnp.argmax(out, axis=1)

    print("KERNEL_OK")
</pallas_src>

<mosaic_0001>
module attributes {stable_mosaic.version = 11 : i64} {
  func.func @bow_linear_kernel(%arg0: i32, %arg1: i32, %arg2: memref<8x16xi32, #tpu.memory_space<vmem>>, %arg3: memref<128x128xf32, #tpu.memory_space<vmem>>, %arg4: memref<1x128xf32, #tpu.memory_space<vmem>>, %arg5: memref<8x128xf32, #tpu.memory_space<vmem>>) attributes {dimension_semantics = [#tpu.dimension_semantics<parallel>, #tpu.dimension_semantics<arbitrary>], iteration_bounds = array<i64: 4, 3>, scalar_prefetch = 0 : i64, scratch_operands = 0 : i64, tpu.core_type = #tpu.core_type<tc>, window_params = [{transform_indices = @transform_0, window_bounds = array<i64: 8, 16>}, {transform_indices = @transform_1, window_bounds = array<i64: 128, 128>}, {pipeline_mode = #tpu.pipeline_mode<synchronous>, transform_indices = @transform_2, window_bounds = array<i64: 1, 128>}, {transform_indices = @transform_3, window_bounds = array<i64: 8, 128>}]} {
    %c0_i32 = arith.constant 0 : i32
    %0 = arith.cmpi eq, %arg1, %c0_i32 : i32
    %1 = arith.extui %0 : i1 to i32
    %c0_i32_0 = arith.constant 0 : i32
    %2 = arith.cmpi ne, %1, %c0_i32_0 : i32
    scf.if %2 {
      %c0_9 = arith.constant 0 : index
      %c0_10 = arith.constant 0 : index
      %20 = vector.load %arg4[%c0_9, %c0_10] : memref<1x128xf32, #tpu.memory_space<vmem>>, vector<1x128xf32>
      %21 = vector.shape_cast %20 : vector<1x128xf32> to vector<1x128xf32>
      %22 = vector.broadcast %21 : vector<1x128xf32> to vector<8x128xf32>
      %c0_11 = arith.constant 0 : index
      %c0_12 = arith.constant 0 : index
      %23 = vector.load %arg5[%c0_11, %c0_12] : memref<8x128xf32, #tpu.memory_space<vmem>>, vector<8x128xf32>
      tpu.vector_store %arg5[%c0_11, %c0_12], %22 {strides = array<i32>} : memref<8x128xf32, #tpu.memory_space<vmem>>, vector<8x128xf32>,
    } else {
    }
    %c128_i32 = arith.constant 128 : i32
    %3 = arith.muli %arg1, %c128_i32 : i32
    %4 = tpu.iota {dimensions = array<i32: 2>} : vector<1x1x128xi32>
    %5 = vector.broadcast %3 : i32 to vector<1x1x128xi32>
    %6 = arith.addi %5, %4 : vector<1x1x128xi32>
    %c0 = arith.constant 0 : index
    %c0_1 = arith.constant 0 : index
    %7 = vector.load %arg2[%c0, %c0_1] : memref<8x16xi32, #tpu.memory_space<vmem>>, vector<8x16xi32>
    %8 = vector.shape_cast %7 : vector<8x16xi32> to vector<8x16x1xi32>
    %9 = vector.broadcast %8 : vector<8x16x1xi32> to vector<8x16x128xi32>
    %10 = vector.broadcast %6 : vector<1x1x128xi32> to vector<8x16x128xi32>
    %11 = arith.cmpi eq, %9, %10 : vector<8x16x128xi32>
    %12 = arith.extui %11 : vector<8x16x128xi1> to vector<8x16x128xi32>
    %13 = arith.sitofp %12 : vector<8x16x128xi32> to vector<8x16x128xf32>
    %cst = arith.constant dense<0.000000e+00> : vector<8x128xf32>
    %14 = vector.multi_reduction <add>, %13, %cst [1] : vector<8x16x128xf32> to vector<8x128xf32>
    %c0_2 = arith.constant 0 : index
    %c0_3 = arith.constant 0 : index
    %15 = vector.load %arg5[%c0_2, %c0_3] : memref<8x128xf32, #tpu.memory_space<vmem>>, vector<8x128xf32>
    %c0_4 = arith.constant 0 : index
    %c0_5 = arith.constant 0 : index
    %16 = vector.load %arg3[%c0_4, %c0_5] : memref<128x128xf32, #tpu.memory_space<vmem>>, vector<128x128xf32>
    %cst_6 = arith.constant dense<0.000000e+00> : vector<8x128xf32>
    %17 = tpu.matmul %14, %16, %cst_6 {dimension_numbers = #tpu.dot_dimension_numbers<[1], [0], [0], [1], [0, 0, 1, 1], [], []>} : vector<8x128xf32>, vector<128x128xf32>, vector<8x128xf32> -> vector<8x128xf32>
    %18 = arith.addf %15, %17 : vector<8x128xf32>
    %c0_7 = arith.constant 0 : index
    %c0_8 = arith.constant 0 : index
    %19 = vector.load %arg5[%c0_7, %c0_8] : memref<8x128xf32, #tpu.memory_space<vmem>>, vector<8x128xf32>
    tpu.vector_store %arg5[%c0_7, %c0_8], %18 {strides = array<i32>} : memref<8x128xf32, #tpu.memory_space<vmem>>, vector<8x128xf32>,
    return
  }
  func.func @transform_0(%arg0: i32, %arg1: i32) -> (i32, i32) {
    %c0_i32 = arith.constant 0 : i32
    %c0_i32_0 = arith.constant 0 : i32
    return %arg0, %c0_i32 : i32, i32
  }
  func.func @transform_1(%arg0: i32, %arg1: i32) -> (i32, i32) {
    %c0_i32 = arith.constant 0 : i32
    %c0_i32_0 = arith.constant 0 : i32
    return %arg1, %c0_i32 : i32, i32
  }
  func.func @transform_2(%arg0: i32, %arg1: i32) -> (i32, i32) {
    %c0_i32 = arith.constant 0 : i32
    %c0_i32_0 = arith.constant 0 : i32
    %c0_i32_1 = arith.constant 0 : i32
    return %c0_i32, %c0_i32_0 : i32, i32
  }
  func.func @transform_3(%arg0: i32, %arg1: i32) -> (i32, i32) {
    %c0_i32 = arith.constant 0 : i32
    %c0_i32_0 = arith.constant 0 : i32
    return %arg0, %c0_i32 : i32, i32
  }
}

</mosaic_0001>

<bundles_post_ra>
// kernel: tpu_custom_call.1
= control target key start
LH: loop header
LB: loop body
LE: loop exit
PB: predicated region body
PF: predicated region fallthrough
CT: control target
= control target key end

     0   :  { %8 = vsyncpa [#allocation3], 0  ;;  %s1358_s0 = inlined_call_operand.vmem [shape: s32[32,16], index: 0, kind: input, shape index: {}]   ;;  %s1359_s1 = inlined_call_operand.hbm [shape: f32[384,128], index: 1, kind: input, shape index: {}]   ;;  %s1360_s2 = inlined_call_operand.vmem [shape: f32[1,128], index: 2, kind: input, shape index: {}]   ;;  %s1361_s3 = inlined_call_operand.hbm [shape: f32[32,128], index: 3, kind: output, shape index: {}]  }
   0x1   :  { %10 = vsyncpa [#allocation3 + $0x1], 0 }
   0x2   :  { %11 = vsyncpa [#allocation4], 0 }
   0x3   :  { %13 = vsyncpa [#allocation4 + $0x1], 0  ;;  %s1047_s12 = smov 0   ;;  %s1049_s13 = smov 0  }
   0x4   :  { %s1051_s14 = smov 0   ;;  %s1053_s15 = smov 0  }
   0x5   :  { %s1055_s16 = smov 0   ;;  %s1057_s17 = smov 0  }
   0x6   :  { %s1059_s18 = smov 0   ;;  %s1061_s19 = smov 0  }
   0x7   :  { %s1063_s20 = smov 0   ;;  %s1065_s21 = smov 0  }
   0x8   :  { %s1067_s22 = smov 0  }
   0x9 LB: > { %s648_s23 = sadd.s32 4294967295, %s1018_s22   ;;  %s649_s24 = sadd.s32 4294967294, %s1018_s22   ;;  %s1018_s22 = sphi %s1067_s22, %s19_s22   ;;  %s1014_s21 = sphi %s1065_s21, %s1382_s21   ;;  %s1010_s20 = sphi %s1063_s20, %s1381_s20   ;;  %s1006_s19 = sphi %s1061_s19, %s1380_s19   ;;  %s1002_s18 = sphi %s1059_s18, %s1379_s18   ;;  %s998_s17 = sphi %s1057_s17, %s1378_s17   ;;  %s994_s16 = sphi %s1055_s16, %s1377_s16   ;;  %s990_s15 = sphi %s1053_s15, %s1376_s15   ;;  %s986_s14 = sphi %s1051_s14, %s1375_s14   ;;  %s982_s13 = sphi %s1049_s13, %s1374_s13   ;;  %s978_s12 = sphi %s1047_s12, %s1373_s12  }
   0xa   : > { %s28_s25 = sadd.s32 1, %s1010_s20  ;;  %s31_s26 = sadd.s32 1, %s1014_s21 }
   0xb   : > { %p29_p0 = scmp.ge.s32.totalorder %s28_s25, 3  ;;  %s64_s27 = sadd.s32 1, %s998_s17 }
   0xc   : > { %p71_p1 = scmp.ne.s32.totalorder %s998_s17, %s994_s16  ;;  %p72_p2 = scmp.eq.s32.totalorder %s1018_s22, 0 }
   0xd   : > { %s1384_s25 = smov (%p29_p0, %s28_s25), 0  ;;  %s1386_s26 = smov (!%p29_p0, %s31_s26), %s1014_s21 }
   0xe   : > { %s61_s28 = ssub.s32 %s1010_s20, %s1384_s25  ;;  %p1113_p3 = por %p72_p2, %p71_p1 }
   0xf   : > { %p33_p4 = scmp.ge.s32.totalorder %s1386_s26, 4  ;;  %p62_p5 = scmp.eq.s32.totalorder %s61_s28, 0 }
  0x10   : > { %p77_p6 = scmp.ne.s32.totalorder %s994_s16, %s990_s15  ;;  %p78_p7 = scmp.eq.s32.totalorder %s648_s23, 0 }
  0x11   : > { %s1388_s26 = smov (%p33_p4, %s1386_s26), 0  ;;  %s111_s6 = sadd.s32 1, %s986_s14 }
  0x12   : > { %1365 = sst [smem:[#allocation8_spill]] %s1388_s26  ;;  %p1123_p8 = por %p78_p7, %p77_p6 }
  0x13   : > { %s1121_s30 = scalar_select %p62_p5, %s998_s17, %s64_s27  }
  0x14   : > { %s108_s5 = ssub.s32 %s1014_s21, %s1388_s26  ;;  %p121_p10 = scmp.ne.s32.totalorder %s986_s14, %s982_s13 }
  0x15   : > { %p109_p9 = scmp.eq.s32.totalorder %s108_s5, 0  ;;  %p122_p11 = scmp.eq.s32.totalorder %s648_s23, 11 }
  0x16   : > { %p127_p13 = scmp.ne.s32.totalorder %s982_s13, %s978_s12  ;;  %p128_p0 = scmp.eq.s32.totalorder %s649_s24, 11 }
  0x17   : > { %s1133_s7 = scalar_select %p109_p9, %s986_s14, %s111_s6  }
  0x18   : > { %p1135_p12 = por %p122_p11, %p121_p10  ;;  %p771_p1 = scmp.lt.s32.totalorder %s1018_s22, 12 }
  0x19   : > { %s158_s9 = sand.u32 1, %s998_s17   ;;  %p1143_p2 = por %p128_p0, %p127_p13 }
  0x1a   : > { %s1367_s8 = scalar_select %p1135_p12, 1, 0 }
  0x1b   : > { %s1368_s10 = scalar_select %p1143_p2, 1, 0 }
  0x1c   : > { %s652_s11 = sshll.u32 %s158_s9, 7  ;;  %s682_s15 = sshll.u32 %s1010_s20, 11 }
  0x1d   : > { %s1151_s23 = scalar_lea.hbm %s1359_s1, %s682_s15  ;;  %s162_s5 = scalar_lea.vmem [#allocation2], %s652_s11 }
  0x1e   : > { %s169_s6 = sshll.u32 %s162_s5, 4  ;;  %p1155_p4 = pnand %p771_p1, %p1113_p3  ;;  %s1159_s6 = int_to_ptr.vmem [resolvable:$true] %s169_s6 }
  0x1f   : > { %s1161_s26 = scalar_lea.sflag [#allocation3], %s158_s9  ;;  %s866_s27 = scalar_lea.hbm %s1151_s23, 2048 }
  0x20   : > { %p867_p5 = scmp.ne.s32.totalorder %s1151_s23, %s866_s27  ;;  %p868_p6 = pneg %p1155_p4 }
  0x21   : > { %s871_s15 = scalar_lea.hbm %s1359_s1, 6144  ;;  %p872_p3 = scmp.lt.u32.totalorder %s1151_s23, %s1359_s1 }
  0x22   : > { %p869_p7 = pnand %p868_p6, %p867_p5  ;;  %p873_p10 = scmp.lt.u32.totalorder %s871_s15, %s866_s27 }
  0x23   : > { %p875_p13 = scmp.lt.u32.totalorder %s866_s27, %s1151_s23 }
  0x24   : > { %p870_p9 = pneg %p869_p7  ;;  %p874_p11 = por %p873_p10, %p872_p3 }
  0x26   : > { %p876_p0 = por %p875_p13, %p874_p11 }
  0x28   : > { %p877_p1 = pnand %p876_p0, %p870_p9 }
  0x2a   : > { %880 = shalt.err (!%p877_p1)
}
  0x2b   : > { %s881_s9 = scalar_lea.vmem %s1159_s6, 2048  ;;  %s1020_s11 = smov [#allocation2]  }
  0x2c   : > { %p882_p5 = scmp.ne.s32.totalorder %s1159_s6, %s881_s9  ;;  %s886_s29 = sshll.u32 %s1020_s11, 4  ;;  %s887_s29 = int_to_ptr.vmem [resolvable:$false] %s886_s29 }
  0x2d   : > { %s888_s28 = scalar_lea.vmem %s887_s29, 4096  ;;  %p889_p12 = scmp.lt.s32.totalorder %s1159_s6, %s887_s29 }
  0x2e   : > { %p884_p7 = pnand %p882_p5, %p868_p6  ;;  %p890_p3 = scmp.lt.s32.totalorder %s888_s28, %s881_s9 }
  0x30   : > { %p885_p2 = pneg %p884_p7  ;;  %p891_p10 = por %p890_p3, %p889_p12 }
  0x32   : > { %p892_p11 = pnand %p891_p10, %p885_p2 }
  0x34   : > { %895 = shalt.err (!%p892_p11)
}
  0x35   : > { %s1021_s27 = smov 128   ;;  %s1022_s15 = smov 8  }
  0x36   : > { %766 = dma.hbm_to_vmem [thread:$0]  (!%p1155_p4), %s1151_s23, 2048, %s1159_s6, %s1161_s26, %s1021_s27, %s1021_s27, %s1022_s15  }
  0x37   : > { %p655_p6 = scmp.ge.s32.totalorder %s1018_s22, 1  ;;  %p177_p9 = scmp.lt.s32.totalorder %s1018_s22, 13 }
  0x39   : > { %p178_p13 = pnand %p655_p6, %p177_p9 }
  0x3a   : > { %s183_s5 = sand.u32 (!%p178_p13), 1, %s994_s16  }
  0x3b   : > { %181 = sbr.rel (%p178_p13) target bundleno = 473 (0x1d9), region = 32  ;;  %s656_s9 = sshll.u32 (!%p178_p13), %s183_s5, 7 }
  0x3c   : > { %s184_s11 = scalar_lea.sflag (!%p178_p13), [#allocation3], %s183_s5  ;;  %s1192_s29 = scalar_lea.vmem (!%p178_p13), [#allocation2], %s656_s9 }
  0x42   : > { %969 = dma.done.wait (%p1123_p8), %s184_s11, 2048  }
  0x43   : > { %971 = vsyncadd (%p1123_p8), %s184_s11, 4294965248  ;;  %s211_s26 = sand.u32 1, %s982_s13   ;;  %p214_p12 = scmp.lt.s32.totalorder %s1006_s19, 3 }
  0x44   : > { %s657_s23 = sshll.u32 %s211_s26, 3  ;;  %p659_p2 = scmp.ne.s32.totalorder %s1002_s18, 0 }
  0x45   : > { %s215_s6 = scalar_select %p214_p12, %s1006_s19, 3 }
  0x46   : > { %s1206_s5 = scalar_lea.vmem [#allocation5], %s657_s23  ;;  %222 = sbr.rel (%p659_p2) target bundleno = 77 (0x4d), region = 40  ;;  %v660_v0 = vld [vmem:[%s1360_s2] ss:$0 sm:$0xff] (!%p659_p2) }
  0x47   : > { %s658_s24 = sshll.u32 %s215_s6, 3  ;;  %230 = vst [vmem:[%s1206_s5] sm:$0xff] (!%p659_p2), %v660_v0 }
  0x48   : > { %s217_s15 = scalar_lea.vmem %s1358_s0, %s658_s24 }
  0x4d PF: > { %v232_v1 = vlaneseq  ;;  %v1216_v3 = vld [vmem:[%s217_s15] sm:$0xff]  ;;  %v431_v9 = vld [vmem:[%s1192_s29 + $0x8] sm:$0xff]  ;;  %v1023_v12 = vmov 0.0|0.0   ;;  %v432_v13 = vld [vmem:[%s1192_s29 + $0x10] sm:$0xff]  ;;  %vm1024_vm0 = vmmov 0   ;;  %v1025_v45 = vmov 0.0  }
  0x4e   : > { %v430_v8 = vld [vmem:[%s1192_s29] sm:$0xff]  ;;  %735 = vmatprep.subr.bf16.mxu0 %v1023_v12  ;;  %v433_v14 = vld [vmem:[%s1192_s29 + $0x18] sm:$0xff]  ;;  %v435_v19 = vld [vmem:[%s1192_s29 + $0x28] sm:$0xff]  ;;  %732 = vmatprep.mubr.msk.f32.mxu0 %vm1024_vm0, %v1025_v45  ;;  %s661_s11 = sshll.u32 %s1002_s18, 7  ;;  %s679_s18 = sshll.u32 %s1006_s19, 7 }
  0x4f   : > { %v1214_v2 = vshrl.u32 %v232_v1, 7  ;;  %v736_v11 = vpack.c.bf16 %v431_v9, %v430_v8  ;;  %v739_v17 = vpack.c.bf16 %v433_v14, %v432_v13  ;;  %v434_v18 = vld [vmem:[%s1192_s29 + $0x20] sm:$0xff]  ;;  %v436_v23 = vld [vmem:[%s1192_s29 + $0x30] sm:$0xff]  ;;  %v437_v24 = vld [vmem:[%s1192_s29 + $0x38] sm:$0xff]  ;;  %v233_v46 = vand.u32 127, %v232_v1  ;;  %s1293_s24 = scalar_lea.hbm %s1361_s3, %s679_s18  ;;  %s542_s28 = scalar_lea.sflag [#allocation4], %s211_s26 }
  0x50   : > { %v742_v22 = vpack.c.bf16 %v435_v19, %v434_v18  ;;  %v745_v27 = vpack.c.bf16 %v437_v24, %v436_v23  ;;  %v438_v28 = vld [vmem:[%s1192_s29 + $0x40] sm:$0xff]  ;;  %v439_v29 = vld [vmem:[%s1192_s29 + $0x48] sm:$0xff]  ;;  %v440_v33 = vld [vmem:[%s1192_s29 + $0x50] sm:$0xff]  ;;  %v234_v47 = vstv %s661_s11  ;;  %p1370_p4 = scmp.ne.s32.totalorder %s1367_s8, 0  ;;  %s1026_s19 = smov [#allocation5]  }
  0x51   : > { %v250_v4 = vsub.s32 1, %v1214_v2  ;;  %v239_v5 = vsub.s32 0, %v1214_v2  ;;  %v261_v10 = vsub.s32 2, %v1214_v2  ;;  %737 = vmatpush3.bf16.msra.mxu0 %v736_v11  ;;  %v272_v16 = vsub.s32 3, %v1214_v2  ;;  %v441_v34 = vld [vmem:[%s1192_s29 + $0x58] sm:$0xff]  ;;  %v442_v38 = vld [vmem:[%s1192_s29 + $0x60] sm:$0xff] }
  0x52   : > { %738 = vmatprep.subr.bf16.mxu0 %v1023_v12  ;;  %v283_v21 = vsub.s32 4, %v1214_v2  ;;  %v294_v26 = vsub.s32 5, %v1214_v2  ;;  %v305_v31 = vsub.s32 6, %v1214_v2  ;;  %v748_v32 = vpack.c.bf16 %v439_v29, %v438_v28  ;;  %v443_v39 = vld [vmem:[%s1192_s29 + $0x68] sm:$0xff]  ;;  %v444_v42 = vld [vmem:[%s1192_s29 + $0x70] sm:$0xff]  ;;  %v445_v43 = vld [vmem:[%s1192_s29 + $0x78] sm:$0xff] }
  0x53   : > { %v251_v6 = vrot.slane %v1216_v3, %v250_v4  ;;  %v240_v7 = vrot.slane %v1216_v3, %v239_v5  ;;  %v262_v15 = vrot.slane %v1216_v3, %v261_v10  ;;  %v273_v20 = vrot.slane %v1216_v3, %v272_v16  ;;  %s555_s29 = sshll.u32 %s1206_s5, 4  ;;  %s900_s15 = sshll.u32 %s1026_s19, 4  ;;  %s1295_s29 = int_to_ptr.vmem [resolvable:$true] %s555_s29  ;;  %s901_s15 = int_to_ptr.vmem [resolvable:$false] %s900_s15 }
  0x54   : > { %v284_v25 = vrot.slane %v1216_v3, %v283_v21  ;;  %v295_v30 = vrot.slane %v1216_v3, %v294_v26  ;;  %v306_v35 = vrot.slane %v1216_v3, %v305_v31  ;;  %v316_v36 = vsub.s32 7, %v1214_v2  ;;  %s896_s27 = scalar_lea.vmem %s1295_s29, 128  ;;  %s902_s4 = scalar_lea.vmem %s901_s15, 256 }
  0x55   : > { %253 = vbcast.lane.b32.xlu1 %v251_v6, 256  ;;  %242 = vbcast.lane.b32.xlu0 %v240_v7, 256  ;;  %v751_v37 = vpack.c.bf16 %v441_v34, %v440_v33  ;;  %v754_v41 = vpack.c.bf16 %v443_v39, %v442_v38  ;;  %v757_v44 = vpack.c.bf16 %v445_v43, %v444_v42  ;;  %p897_p8 = scmp.ne.s32.totalorder %s1295_s29, %s896_s27  ;;  %p903_p5 = scmp.lt.s32.totalorder %s1295_s29, %s901_s15 }
  0x56   : > { %740 = vmatpush3.bf16.msra.mxu0 %v739_v17  ;;  %v317_v40 = vrot.slane %v1216_v3, %v316_v36  ;;  %v1253_v50 = vadd.s32 %v234_v47, %v233_v46  ;;  %p904_p7 = scmp.lt.s32.totalorder %s902_s4, %s896_s27 }
  0x57   : > { %741 = vmatprep.subr.bf16.mxu0 %v1023_v12  ;;  %p898_p0 = pnand %p897_p8, %p1370_p4 }
  0x58   : > { %p905_p3 = por %p904_p7, %p903_p5 }
  0x59   : > { %257 = vbcast.lane.b32.xlu1 %v251_v6, 264  ;;  %246 = vbcast.lane.b32.xlu0 %v240_v7, 264  ;;  %p899_p1 = pneg %p898_p0 }
  0x5a   : > { %743 = vmatpush3.bf16.msra.mxu0 %v742_v22 }
  0x5b   : > { %744 = vmatprep.subr.bf16.mxu0 %v1023_v12  ;;  %p906_p10 = pnand %p905_p3, %p899_p1 }
  0x5d   : > { %268 = vbcast.lane.b32.xlu1 %v262_v15, 264  ;;  %264 = vbcast.lane.b32.xlu0 %v262_v15, 256 }
  0x5e   : > { %746 = vmatpush3.bf16.msra.mxu0 %v745_v27 }
  0x5f   : > { %747 = vmatprep.subr.bf16.mxu0 %v1023_v12 }
  0x61   : > { %279 = vbcast.lane.b32.xlu1 %v273_v20, 264  ;;  %275 = vbcast.lane.b32.xlu0 %v273_v20, 256 }
  0x62   : > { %749 = vmatpush3.bf16.msra.mxu0 %v748_v32 }
  0x63   : > { %750 = vmatprep.subr.bf16.mxu0 %v1023_v12 }
  0x65   : > { %290 = vbcast.lane.b32.xlu1 %v284_v25, 264  ;;  %286 = vbcast.lane.b32.xlu0 %v284_v25, 256 }
  0x66   : > { %752 = vmatpush3.bf16.msra.mxu0 %v751_v37 }
  0x67   : > { %753 = vmatprep.subr.bf16.mxu0 %v1023_v12 }
  0x69   : > { %301 = vbcast.lane.b32.xlu1 %v295_v30, 264  ;;  %297 = vbcast.lane.b32.xlu0 %v295_v30, 256 }
  0x6a   : > { %755 = vmatpush3.bf16.msra.mxu0 %v754_v41 }
  0x6b   : > { %756 = vmatprep.subr.bf16.mxu0 %v1023_v12 }
  0x6d   : > { %312 = vbcast.lane.b32.xlu1 %v306_v35, 264  ;;  %308 = vbcast.lane.b32.xlu0 %v306_v35, 256 }
  0x6e   : > { %758 = vmatpush3.bf16.msra.mxu0 %v757_v44 }
  0x71   : > { %323 = vbcast.lane.b32.xlu1 %v317_v40, 264  ;;  %319 = vbcast.lane.b32.xlu0 %v317_v40, 256 }
  0xc7   : > { %v254_v48 = vpop.permute.xlu1 %253  ;;  %v243_v49 = vpop.permute.xlu0 %242 }
  0xc8   : > { %vm327_vm3 = vcmp.eq.s32.totalorder %v254_v48, %v1253_v50  ;;  %vm325_vm4 = vcmp.eq.s32.totalorder %v243_v49, %v1253_v50 }
  0xc9   : > { %v664_v57 = vsel %vm327_vm3, 1.0, %v1025_v45  ;;  %v662_v58 = vsel %vm325_vm4, 1.0, %v1025_v45  ;;  %vm458_vm3 = vcmask 1043459   ;;  %vm460_vm4 = vcmask 1044484  }
  0xcb   : > { %v258_v51 = vpop.permute.xlu1 %257  ;;  %v247_v52 = vpop.permute.xlu0 %246 }
  0xcc   : > { %vm328_vm1 = vcmp.eq.s32.totalorder %v258_v51, %v1253_v50  ;;  %vm326_vm2 = vcmp.eq.s32.totalorder %v247_v52, %v1253_v50 }
  0xcd   : > { %v665_v53 = vsel %vm328_vm1, 1.0, %v1025_v45  ;;  %v663_v54 = vsel %vm326_vm2, 1.0, %v1025_v45  ;;  %vm454_vm1 = vcmask 1041409   ;;  %vm456_vm2 = vcmask 1042434  }
  0xce   : > { %v380_v59 = vadd.f32 %v665_v53, %v664_v57  ;;  %v373_v62 = vadd.f32 %v663_v54, %v662_v58 }
  0xcf   : > { %v269_v55 = vpop.permute.xlu1 %268  ;;  %v265_v56 = vpop.permute.xlu0 %264 }
  0xd0   : > { %vm330_vm5 = vcmp.eq.s32.totalorder %v269_v55, %v1253_v50  ;;  %vm329_vm6 = vcmp.eq.s32.totalorder %v265_v56, %v1253_v50  ;;  %v381_v2 = vrot.slane %v380_v59, 4  ;;  %v374_v4 = vrot.slane %v373_v62, 4 }
  0xd1   : > { %v667_v60 = vsel %vm330_vm5, 1.0, %v1025_v45  ;;  %v666_v61 = vsel %vm329_vm6, 1.0, %v1025_v45  ;;  %vm462_vm5 = vcmask 1045509   ;;  %vm464_vm6 = vcmask 1046534  }
  0xd2   : > { %v387_v63 = vadd.f32 %v667_v60, %v666_v61  ;;  %v382_v10 = vadd.f32 %v381_v2, %v380_v59  ;;  %v375_v13 = vadd.f32 %v374_v4, %v373_v62 }
  0xd3   : > { %v280_v0 = vpop.permute.xlu1 %279  ;;  %v276_v1 = vpop.permute.xlu0 %275 }
  0xd4   : > { %vm332_vm7 = vcmp.eq.s32.totalorder %v280_v0, %v1253_v50  ;;  %vm331_vm8 = vcmp.eq.s32.totalorder %v276_v1, %v1253_v50  ;;  %v388_v6 = vrot.slane %v387_v63, 4  ;;  %v383_v20 = vrot.slane %v382_v10, 2 }
  0xd5   : > { %v669_v3 = vsel %vm332_vm7, 1.0, %v1025_v45  ;;  %v668_v5 = vsel %vm331_vm8, 1.0, %v1025_v45  ;;  %v376_v24 = vrot.slane %v375_v13, 2  ;;  %vm466_vm7 = vcmask 1047559  }
  0xd6   : > { %v394_v7 = vadd.f32 %v669_v3, %v668_v5  ;;  %v389_v15 = vadd.f32 %v388_v6, %v387_v63  ;;  %v384_v32 = vadd.f32 %v383_v20, %v382_v10 }
  0xd7   : > { %v291_v8 = vpop.permute.xlu1 %290  ;;  %v287_v9 = vpop.permute.xlu0 %286  ;;  %v377_v36 = vadd.f32 %v376_v24, %v375_v13 }
  0xd8   : > { %vm334_vm9 = vcmp.eq.s32.totalorder %v291_v8, %v1253_v50  ;;  %v395_v11 = vrot.slane %v394_v7, 4  ;;  %vm333_vm10 = vcmp.eq.s32.totalorder %v287_v9, %v1253_v50  ;;  %v390_v26 = vrot.slane %v389_v15, 2 }
  0xd9   : > { %v671_v12 = vsel %vm334_vm9, 1.0, %v1025_v45  ;;  %v670_v14 = vsel %vm333_vm10, 1.0, %v1025_v45  ;;  %v385_v46 = vrot.slane %v384_v32, 1  ;;  %v378_v51 = vrot.slane %v377_v36, 1 }
  0xda   : > { %v396_v16 = vadd.f32 %v395_v11, %v394_v7  ;;  %v401_v17 = vadd.f32 %v671_v12, %v670_v14  ;;  %v391_v39 = vadd.f32 %v390_v26, %v389_v15 }
  0xdb   : > { %v302_v18 = vpop.permute.xlu1 %301  ;;  %v298_v19 = vpop.permute.xlu0 %297  ;;  %v386_v59 = vadd.f32 %v385_v46, %v384_v32  ;;  %v379_v61 = vadd.f32 %v378_v51, %v377_v36 }
  0xdc   : > { %vm336_vm11 = vcmp.eq.s32.totalorder %v302_v18, %v1253_v50  ;;  %vm335_vm12 = vcmp.eq.s32.totalorder %v298_v19, %v1253_v50  ;;  %v402_v21 = vrot.slane %v401_v17, 4  ;;  %v397_v27 = vrot.slane %v396_v16, 2 }
  0xdd   : > { %v673_v22 = vsel %vm336_vm11, 1.0, %v1025_v45  ;;  %v672_v23 = vsel %vm335_vm12, 1.0, %v1025_v45  ;;  %v392_v55 = vrot.slane %v391_v39, 1  ;;  %v455_v4 = vsel %vm454_vm1, %v386_v59, %v379_v61 }
  0xde   : > { %v408_v25 = vadd.f32 %v673_v22, %v672_v23  ;;  %v403_v28 = vadd.f32 %v402_v21, %v401_v17  ;;  %v398_v40 = vadd.f32 %v397_v27, %v396_v16  ;;  %v429_v16 = vld [vmem:[%s1206_s5] sm:$0xff] }
  0xdf   : > { %v313_v29 = vpop.permute.xlu1 %312  ;;  %v309_v30 = vpop.permute.xlu0 %308  ;;  %v393_v0 = vadd.f32 %v392_v55, %v391_v39 }
  0xe0   : > { %v409_v31 = vrot.slane %v408_v25, 4  ;;  %vm338_vm13 = vcmp.eq.s32.totalorder %v313_v29, %v1253_v50  ;;  %vm337_vm14 = vcmp.eq.s32.totalorder %v309_v30, %v1253_v50  ;;  %v404_v33 = vrot.slane %v403_v28, 2 }
  0xe1   : > { %v675_v34 = vsel %vm338_vm13, 1.0, %v1025_v45  ;;  %v674_v35 = vsel %vm337_vm14, 1.0, %v1025_v45  ;;  %v399_v56 = vrot.slane %v398_v40, 1  ;;  %v457_v8 = vsel %vm456_vm2, %v393_v0, %v455_v4 }
  0xe2   : > { %v410_v37 = vadd.f32 %v409_v31, %v408_v25  ;;  %v415_v38 = vadd.f32 %v675_v34, %v674_v35  ;;  %v405_v47 = vadd.f32 %v404_v33, %v403_v28 }
  0xe3   : > { %v324_v41 = vpop.permute.xlu1 %323  ;;  %v320_v42 = vpop.permute.xlu0 %319  ;;  %v400_v1 = vadd.f32 %v399_v56, %v398_v40 }
  0xe4   : > { %v411_v43 = vrot.slane %v410_v37, 2  ;;  %v416_v44 = vrot.slane %v415_v38, 4  ;;  %vm340_vm15 = vcmp.eq.s32.totalorder %v324_v41, %v1253_v50  ;;  %vm339_vm0 = vcmp.eq.s32.totalorder %v320_v42, %v1253_v50 }
  0xe5   : > { %v677_v48 = vsel %vm340_vm15, 1.0, %v1025_v45  ;;  %v676_v49 = vsel %vm339_vm0, 1.0, %v1025_v45  ;;  %v406_v60 = vrot.slane %v405_v47, 1  ;;  %v459_v10 = vsel %vm458_vm3, %v400_v1, %v457_v8 }
  0xe6   : > { %v412_v52 = vadd.f32 %v411_v43, %v410_v37  ;;  %v417_v53 = vadd.f32 %v416_v44, %v415_v38  ;;  %v422_v54 = vadd.f32 %v677_v48, %v676_v49 }
  0xe7   : > { %v407_v45 = vadd.f32 %v406_v60, %v405_v47 }
  0xe8   : > { %v418_v57 = vrot.slane %v417_v53, 2  ;;  %v423_v58 = vrot.slane %v422_v54, 4  ;;  %v413_v62 = vrot.slane %v412_v52, 1 }
  0xe9   : > { %v461_v11 = vsel %vm460_vm4, %v407_v45, %v459_v10 }
  0xea   : > { %v419_v63 = vadd.f32 %v418_v57, %v417_v53  ;;  %v424_v50 = vadd.f32 %v423_v58, %v422_v54  ;;  %v414_v5 = vadd.f32 %v413_v62, %v412_v52 }
  0xec   : > { %v420_v2 = vrot.slane %v419_v63, 1  ;;  %v425_v3 = vrot.slane %v424_v50, 2  ;;  %v463_v13 = vsel %vm462_vm5, %v414_v5, %v461_v11 }
  0xee   : > { %v426_v6 = vadd.f32 %v425_v3, %v424_v50  ;;  %v421_v7 = vadd.f32 %v420_v2, %v419_v63 }
  0xf0   : > { %v427_v9 = vrot.slane %v426_v6, 1  ;;  %v465_v14 = vsel %vm464_vm6, %v421_v7, %v463_v13 }
  0xf2   : > { %v428_v12 = vadd.f32 %v427_v9, %v426_v6 }
  0xf4   : > { %v467_v15 = vsel %vm466_vm7, %v428_v12, %v465_v14 }
  0xf5   : > { %733 = vmatmul.mubr.f32.vlgmr.msra.gmra.mrb[0].mxu0 %v467_v15 }
 0x1c8   : > { %v535_v17 = vpop.f32.mrb[0].mxu0 }
 0x1c9   : > { %v539_v18 = vadd.f32 %v535_v17, %v429_v16  ;;  %v734_v19 = vpop.f32.mrb[1].mxu0 }
 0x1cb   : > { %540 = vst [vmem:[%s1206_s5] sm:$0xff] %v539_v18 }
 0x1cc   : > { %909 = shalt.err (!%p906_p10)
}
 0x1cd   : > { %s910_s26 = scalar_lea.hbm %s1293_s24, 128  ;;  %s914_s11 = scalar_lea.hbm %s1361_s3, 512 }
 0x1ce   : > { %p911_p11 = scmp.ne.s32.totalorder %s1293_s24, %s910_s26  ;;  %p915_p13 = scmp.lt.u32.totalorder %s1293_s24, %s1361_s3 }
 0x1cf   : > { %p916_p12 = scmp.lt.u32.totalorder %s914_s11, %s910_s26  ;;  %p918_p8 = scmp.lt.u32.totalorder %s910_s26, %s1293_s24 }
 0x1d0   : > { %p912_p6 = pnand %p911_p11, %p1370_p4 }
 0x1d1   : > { %p917_p2 = por %p916_p12, %p915_p13 }
 0x1d2   : > { %p913_p9 = pneg %p912_p6 }
 0x1d3   : > { %p919_p0 = por %p918_p8, %p917_p2 }
 0x1d5   : > { %p920_p1 = pnand %p919_p0, %p913_p9 }
 0x1d7   : > { %923 = shalt.err (!%p920_p1)
}
 0x1d8   : > { %761 = dma.vmem_to_hbm [thread:$0]  (%p1370_p4), %s1295_s29, 128, %s1293_s24, %s542_s28  }
 0x1d9 PF: > { %p772_p5 = scmp.ge.s32.totalorder %s1018_s22, 2  ;;  %s567_s6 = sand.u32 1, %s978_s12  }
 0x1da   : > { %p1371_p7 = scmp.ne.s32.totalorder %s1368_s10, 0  ;;  %s568_s27 = scalar_lea.sflag [#allocation4], %s567_s6 }
 0x1dc   : > { %p768_p3 = pnand %p772_p5, %p1371_p7 }
 0x1de   : > { %973 = dma.done.wait (!%p768_p3), %s568_s27, 128  }
 0x1df   : > { %975 = vsyncadd (!%p768_p3), %s568_s27, 4294967168  ;;  %s19_s22 = sadd.s32 1, %s1018_s22   ;;  %s1372_s8 = sld [smem:[#allocation8_spill]] }
 0x1e0   : > { %p16_p10 = scmp.ge.s32.totalorder %s19_s22, 14   ;;  %s1373_s12 = smov %s982_s13 }
 0x1e1   : > { %s1374_s13 = smov %s986_s14  ;;  %s1375_s14 = smov %s1133_s7 }
 0x1e2   : > { %s1376_s15 = smov %s994_s16  ;;  %s1377_s16 = smov %s998_s17 }
 0x1e3   : > { %s1378_s17 = smov %s1121_s30  ;;  %s1379_s18 = smov %s1010_s20 }
 0x1e4   : > { %s1380_s19 = smov %s1014_s21  ;;  %s1381_s20 = smov %s1384_s25 }
 0x1e5   : > { %s1382_s21 = smov %s1372_s8  ;;  %18 = sbr.rel (!%p16_p10) target bundleno = 9 (0x9), region = 84 }
 0x1ec   :  { %573 = vsyncpa [#allocation3], 1 }
 0x1ed   :  { %575 = vsyncpa [#allocation3 + $0x1], 1 }
 0x1ee   :  { %576 = vsyncpa [#allocation4], 1 }
 0x1ef   :  { %578 = vsyncpa [#allocation4 + $0x1], 1 }

</bundles_post_ra>
